<compile_context>
chip_gen: v7x
topology: tpu7x:2x2x1
jax: 0.10.0
libtpu: 0.0.40
codegen_flags: <defaults>
</compile_context>

<pallas_src>
import functools
import math

import jax
import jax.numpy as jnp
from jax.experimental import pallas as pl
from jax.experimental.pallas import tpu as pltpu


def _cdiv(a, b):
    return -(-a // b)


def _physical_vmem_bytes():
    """Physical VMEM of the current chip; conservative 64 MiB fallback."""
    default = 64 << 20
    try:
        cap = int(getattr(pltpu.get_tpu_info(), "vmem_capacity_bytes", default))
        return cap if cap > 0 else default
    except Exception:
        return default


def _ada_hyperedge_kernel(x_ref, proto_ref, w_ctx_avg_ref, w_ctx_max_ref,
                          b_ctx_ref, w_proj_ref, b_proj_ref, out_ref,
                          *, num_heads):
    """One grid step == `bt` batch elements, fully fused.

    Kernel-internal / output layout is lane-dense (bt, E, N): the softmax node
    axis N sits on the lane axis, so exp/sum/normalize use full vregs and the
    stores are unmasked whenever N is a multiple of 128 (production scale).
    """
    bt, N, D = x_ref.shape
    E = out_ref.shape[1]
    head_dim = D // num_heads
    mm_dtype = w_proj_ref.dtype            # bf16 MXU operands or f32

    # X arrives in its HBM dtype (f32 or bf16); all VPU/EUP math is f32.
    x = x_ref[...].astype(jnp.float32)                       # (bt, N, D)

    # ---- global context ('both'): per-batch mean & max over nodes ----
    avg_ctx = jnp.mean(x, axis=1)                             # (bt, D)
    max_ctx = jnp.max(x, axis=1)                              # (bt, D)

    # ---- context_net, concat-free: two MXU dots sharing an f32 accumulator ----
    off = jnp.dot(avg_ctx.astype(mm_dtype), w_ctx_avg_ref[...],
                  preferred_element_type=jnp.float32)
    off = off + jnp.dot(max_ctx.astype(mm_dtype), w_ctx_max_ref[...],
                        preferred_element_type=jnp.float32)
    # Bias + base prototypes added in the lane-dense flat (bt, E*D) layout;
    # one reshape afterwards (the D<128 lane-split happens only once).
    protos = (off + b_ctx_ref[...] + proto_ref[...]).reshape(bt, E, D)

    # ---- pre_head_proj fused over all bt*N rows: one MXU matmul ----
    # (bt, N) -> bt*N merge is layout-free when N % 8 == 0.
    xp = jnp.dot(x.reshape(bt * N, D).astype(mm_dtype), w_proj_ref[...],
                 preferred_element_type=jnp.float32)
    xp = (xp + b_proj_ref[...]).reshape(bt, N, D)             # (bt, N, D) f32

    # ---- multi-head similarity ----
    # mean_h( X_h @ P_h^T / sqrt(head_dim) ) == (X @ P^T) / (sqrt(head_dim)*H)
    # because the module splits D contiguously per head, so the head split
    # fuses into a single batched MXU matmul.  Logits emitted lane-dense.
    scale = 1.0 / (math.sqrt(head_dim) * num_heads)
    logits = jnp.einsum("bed,bnd->ben",
                        protos.astype(mm_dtype), xp.astype(mm_dtype),
                        preferred_element_type=jnp.float32) * scale  # (bt,E,N)

    # TODO(synk): nn.Dropout(p) on logits is identity in eval mode; omitted
    # (this kernel is inference-only).

    # ---- softmax over the node axis (lane axis here), all in f32 ----
    m = jnp.max(logits, axis=-1, keepdims=True)               # (bt, E, 1)
    ex = jnp.exp(logits - m)                                  # (bt, E, N)
    denom = jnp.sum(ex, axis=-1, keepdims=True)               # (bt, E, 1)
    # EUP approximate reciprocal + two Newton refinements (~exact f32 divide)
    # keeps the divide off the VPU slot.
    r = pl.reciprocal(denom, approx=True)
    r = r * (2.0 - denom * r)
    r = r * (2.0 - denom * r)
    out_ref[...] = (ex * r).astype(out_ref.dtype)


def ada_hyperedge_gen(x, params, *, num_heads, batch_tile=None,
                      use_bf16_matmul=False, bf16_io=False,
                      output_layout="bne"):
    """AdaHyperedgeGen forward (context='both', eval mode).

    Weights are consumed as (in, out); PyTorch nn.Linear stores (out, in) —
    transpose when importing real checkpoints.

    use_bf16_matmul: bf16 MXU operands (valid on v5e/v6e/v7x; accumulation and
        all elementwise math stay f32).
    bf16_io: stream X and A over HBM as bf16 (kernel is HBM-bound; halves the
        dominant traffic).  In-kernel compute stays f32.
    output_layout: "bne" -> (B, N, E) exactly like the module (one wrapper
        transpose); "ben" -> lane-dense (B, E, N), no transpose.
    """
    B, N, D = x.shape
    proto = params["prototype_base"]                       # (E, D)
    w_ctx = params["w_ctx"]                                # (2D, E*D)
    b_ctx = params["b_ctx"]                                # (1, E*D)
    w_proj = params["w_proj"]                              # (D, D)
    b_proj = params["b_proj"]                              # (1, D)
    E = proto.shape[0]
    if D % num_heads != 0:
        raise ValueError(f"node_dim={D} must be divisible by num_heads={num_heads}")

    # Split the stacked context weight into its mean/max halves once in the
    # wrapper (pure layout work in XLA; removes the in-kernel concat) and
    # flatten the prototype base to the (1, E*D) layout the kernel adds it in.
    w_ctx_avg, w_ctx_max = w_ctx[:D], w_ctx[D:]
    proto_flat = proto.reshape(1, E * D)

    if use_bf16_matmul:
        # bf16 MXU operands are native on v5e/v6e/v7x (only bf16 VPU/EUP is
        # missing on v5e, and all elementwise math here is f32).
        w_ctx_avg = w_ctx_avg.astype(jnp.bfloat16)
        w_ctx_max = w_ctx_max.astype(jnp.bfloat16)
        w_proj = w_proj.astype(jnp.bfloat16)

    io_dtype = jnp.bfloat16 if bf16_io else jnp.float32
    out_dtype = jnp.bfloat16 if bf16_io else jnp.float32
    x_in = x.astype(io_dtype)

    # ---- scoped-VMEM cap: ~85% of physical with >=8 MiB headroom ----
    phys = _physical_vmem_bytes()          # 128 MiB v5e/v6e, 64 MiB v7x
    vmem_cap = max(32 << 20, min(int(phys * 0.85), phys - (8 << 20)))

    weight_bytes = sum(int(a.size) * a.dtype.itemsize
                       for a in (proto_flat, w_ctx_avg, w_ctx_max, b_ctx,
                                 w_proj, b_proj))
    # TODO(synk): if production-scale w_ctx halves exceed ~8-16 MiB each, add
    # an E-tile grid axis and pipeline them via BlockSpec instead of holding
    # them whole in VMEM (matters most on v7x's 64 MiB).

    # ---- batch tile sized by a byte budget (HBM-bound kernel) ----
    x_isz = jnp.dtype(io_dtype).itemsize
    o_isz = jnp.dtype(out_dtype).itemsize
    per_elem_io = 2 * (N * D * x_isz + E * N * o_isz)         # double-buffered blocks
    per_elem_tmp = 4 * (2 * N * D + 2 * E * D + 3 * E * N)    # f32 intermediates
    per_elem = max(1, per_elem_io + per_elem_tmp)
    budget = vmem_cap - weight_bytes - (4 << 20)
    bt_vmem = max(1, budget // per_elem)
    # Target >= ~4 MiB of X per grid step (amortizes ~0.35 us/step overhead).
    bt_target = max(1, _cdiv(4 << 20, N * D * x_isz))
    bt = min(bt_vmem, bt_target, B)
    if B >= 2:
        bt = min(bt, _cdiv(B, 2))   # keep >=2 grid steps: v7x 2-TC split
    bt = max(1, int(bt))
    if batch_tile is not None:
        bt = max(1, min(int(batch_tile), B))

    # cdiv grid + zero-padded last tile (no divisor-search degradation).
    n_steps = _cdiv(B, bt)
    b_pad = n_steps * bt
    if b_pad != B:
        x_in = jnp.pad(x_in, ((0, b_pad - B), (0, 0), (0, 0)))

    kernel = functools.partial(_ada_hyperedge_kernel, num_heads=num_heads)
    vmem_full = pl.BlockSpec(memory_space=pltpu.MemorySpace.VMEM)

    out_ben = pl.pallas_call(
        kernel,
        out_shape=jax.ShapeDtypeStruct((b_pad, E, N), out_dtype),
        grid_spec=pltpu.PrefetchScalarGridSpec(
            num_scalar_prefetch=0,
            grid=(n_steps,),
            in_specs=[
                pl.BlockSpec((bt, N, D), lambda i: (i, 0, 0)),  # X (pipelined)
                vmem_full,   # prototype_base (1, E*D)   loaded once, single-buffered
                vmem_full,   # context_net W, mean half (D, E*D)
                vmem_full,   # context_net W, max half  (D, E*D)
                vmem_full,   # context_net b (1, E*D)
                vmem_full,   # pre_head_proj W (D, D)
                vmem_full,   # pre_head_proj b (1, D)
            ],
            out_specs=pl.BlockSpec((bt, E, N), lambda i: (i, 0, 0)),
        ),
        compiler_params=pltpu.CompilerParams(
            dimension_semantics=("parallel",),
            vmem_limit_bytes=int(vmem_cap)),
    )(x_in, proto_flat, w_ctx_avg, w_ctx_max, b_ctx, w_proj, b_proj)

    out_ben = out_ben[:B]
    if output_layout == "ben":
        return out_ben                       # lane-dense (B, E, N)
    # Module layout (B, N, E); softmax was taken over N, matching dim=1.
    return jnp.swapaxes(out_ben, 1, 2)


def init_params(key, node_dim, num_hyperedges):
    """Deterministic synthetic init mirroring the PyTorch shapes/init styles."""
    k1, k2, k3, k4, k5 = jax.random.split(key, 5)
    # xavier_uniform_ for prototype_base
    bp = math.sqrt(6.0 / (num_hyperedges + node_dim))
    proto = jax.random.uniform(k1, (num_hyperedges, node_dim), jnp.float32, -bp, bp)
    # context_net: Linear(2D, E*D); stored as (in, out) so kernel does x @ W + b
    in_ctx, out_ctx = 2 * node_dim, num_hyperedges * node_dim
    bc = 1.0 / math.sqrt(in_ctx)
    w_ctx = jax.random.uniform(k2, (in_ctx, out_ctx), jnp.float32, -bc, bc)
    b_ctx = jax.random.uniform(k3, (1, out_ctx), jnp.float32, -bc, bc)
    # pre_head_proj: Linear(D, D)
    bpj = 1.0 / math.sqrt(node_dim)
    w_proj = jax.random.uniform(k4, (node_dim, node_dim), jnp.float32, -bpj, bpj)
    b_proj = jax.random.uniform(k5, (1, node_dim), jnp.float32, -bpj, bpj)
    return dict(prototype_base=proto, w_ctx=w_ctx, b_ctx=b_ctx,
                w_proj=w_proj, b_proj=b_proj)


def reference(x, params, num_heads):
    """Pure-JAX transcription of the PyTorch forward (context='both', eval)."""
    B, N, D = x.shape
    proto = params["prototype_base"]
    E = proto.shape[0]
    head_dim = D // num_heads
    ctx = jnp.concatenate([x.mean(axis=1), x.max(axis=1)], axis=-1)        # (B, 2D)
    off = (ctx @ params["w_ctx"] + params["b_ctx"][0]).reshape(B, E, D)
    prototypes = proto[None] + off
    xp = x @ params["w_proj"] + params["b_proj"][0]
    xh = xp.reshape(B, N, num_heads, head_dim).transpose(0, 2, 1, 3)
    ph = prototypes.reshape(B, E, num_heads, head_dim).transpose(0, 2, 1, 3)
    logits = jnp.einsum("bhnd,bhed->bhne", xh, ph) / math.sqrt(head_dim)
    logits = logits.mean(axis=1)                                            # (B, N, E)
    return jax.nn.softmax(logits, axis=1)                                   # softmax over N


if __name__ == "__main__":
    B, N, D = 2, 8, 32          # batch, nodes, node_dim
    E, H = 16, 4                # num_hyperedges, num_heads

    key = jax.random.PRNGKey(0)
    kx, kp = jax.random.split(key)
    x = jax.random.normal(kx, (B, N, D), dtype=jnp.float32)
    params = init_params(kp, node_dim=D, num_hyperedges=E)

    ref = jax.block_until_ready(reference(x, params, H))

    # f32 path: module-exact semantics, tight tolerance.
    out = jax.block_until_ready(ada_hyperedge_gen(x, params, num_heads=H))
    assert out.shape == (B, N, E)
    assert jnp.allclose(out, ref, rtol=5e-5, atol=5e-5), "f32 kernel mismatch"

    # Fast path: bf16 X/A at the HBM boundary + bf16 MXU operands (valid on
    # v5e/v6e/v7x); f32 accumulation and elementwise math keep it close.
    out_fast = jax.block_until_ready(
        ada_hyperedge_gen(x, params, num_heads=H,
                          use_bf16_matmul=True, bf16_io=True))
    assert out_fast.shape == (B, N, E)
    assert jnp.allclose(out_fast.astype(jnp.float32), ref,
                        rtol=5e-2, atol=5e-2), "bf16 kernel drift"

    print("KERNEL_OK")
</pallas_src>

<mosaic_0001>
module attributes {stable_mosaic.version = 11 : i64} {
  func.func @_ada_hyperedge_kernel(%arg0: i32, %arg1: memref<1x8x32xf32, #tpu.memory_space<vmem>>, %arg2: memref<1x512xf32, #tpu.memory_space<vmem>>, %arg3: memref<32x512xf32, #tpu.memory_space<vmem>>, %arg4: memref<32x512xf32, #tpu.memory_space<vmem>>, %arg5: memref<1x512xf32, #tpu.memory_space<vmem>>, %arg6: memref<32x32xf32, #tpu.memory_space<vmem>>, %arg7: memref<1x32xf32, #tpu.memory_space<vmem>>, %arg8: memref<1x16x8xf32, #tpu.memory_space<vmem>>) attributes {dimension_semantics = [#tpu.dimension_semantics<parallel>], iteration_bounds = array<i64: 2>, scalar_prefetch = 0 : i64, scratch_operands = 0 : i64, tpu.core_type = #tpu.core_type<tc>, window_params = [{transform_indices = @transform_0, window_bounds = array<i64: 1, 8, 32>}, {pipeline_mode = #tpu.pipeline_mode<synchronous>, transform_indices = @transform_1, window_bounds = array<i64: 1, 512>}, {pipeline_mode = #tpu.pipeline_mode<synchronous>, transform_indices = @transform_2, window_bounds = array<i64: 32, 512>}, {pipeline_mode = #tpu.pipeline_mode<synchronous>, transform_indices = @transform_3, window_bounds = array<i64: 32, 512>}, {pipeline_mode = #tpu.pipeline_mode<synchronous>, transform_indices = @transform_4, window_bounds = array<i64: 1, 512>}, {pipeline_mode = #tpu.pipeline_mode<synchronous>, transform_indices = @transform_5, window_bounds = array<i64: 32, 32>}, {pipeline_mode = #tpu.pipeline_mode<synchronous>, transform_indices = @transform_6, window_bounds = array<i64: 1, 32>}, {transform_indices = @transform_7, window_bounds = array<i64: 1, 16, 8>}]} {
    %c0 = arith.constant 0 : index
    %c0_0 = arith.constant 0 : index
    %c0_1 = arith.constant 0 : index
    %0 = vector.load %arg1[%c0, %c0_0, %c0_1] : memref<1x8x32xf32, #tpu.memory_space<vmem>>, vector<1x8x32xf32>
    %cst = arith.constant dense<0.000000e+00> : vector<1x32xf32>
    %1 = vector.multi_reduction <add>, %0, %cst [1] : vector<1x8x32xf32> to vector<1x32xf32>
    %cst_2 = arith.constant 8.000000e+00 : f32
    %2 = vector.broadcast %cst_2 : f32 to vector<1x32xf32>
    %3 = arith.divf %1, %2 : vector<1x32xf32>
    %cst_3 = arith.constant dense<0xFF800000> : vector<1x32xf32>
    %4 = vector.multi_reduction <maximumf>, %0, %cst_3 [1] : vector<1x8x32xf32> to vector<1x32xf32>
    %c0_4 = arith.constant 0 : index
    %c0_5 = arith.constant 0 : index
    %5 = vector.load %arg3[%c0_4, %c0_5] : memref<32x512xf32, #tpu.memory_space<vmem>>, vector<32x512xf32>
    %cst_6 = arith.constant dense<0.000000e+00> : vector<1x512xf32>
    %6 = tpu.matmul %3, %5, %cst_6 {dimension_numbers = #tpu.dot_dimension_numbers<[1], [0], [0], [1], [0, 0, 1, 1], [], []>} : vector<1x32xf32>, vector<32x512xf32>, vector<1x512xf32> -> vector<1x512xf32>
    %c0_7 = arith.constant 0 : index
    %c0_8 = arith.constant 0 : index
    %7 = vector.load %arg4[%c0_7, %c0_8] : memref<32x512xf32, #tpu.memory_space<vmem>>, vector<32x512xf32>
    %cst_9 = arith.constant dense<0.000000e+00> : vector<1x512xf32>
    %8 = tpu.matmul %4, %7, %cst_9 {dimension_numbers = #tpu.dot_dimension_numbers<[1], [0], [0], [1], [0, 0, 1, 1], [], []>} : vector<1x32xf32>, vector<32x512xf32>, vector<1x512xf32> -> vector<1x512xf32>
    %9 = arith.addf %6, %8 : vector<1x512xf32>
    %c0_10 = arith.constant 0 : index
    %c0_11 = arith.constant 0 : index
    %10 = vector.load %arg5[%c0_10, %c0_11] : memref<1x512xf32, #tpu.memory_space<vmem>>, vector<1x512xf32>
    %11 = arith.addf %9, %10 : vector<1x512xf32>
    %c0_12 = arith.constant 0 : index
    %c0_13 = arith.constant 0 : index
    %12 = vector.load %arg2[%c0_12, %c0_13] : memref<1x512xf32, #tpu.memory_space<vmem>>, vector<1x512xf32>
    %13 = arith.addf %11, %12 : vector<1x512xf32>
    %14 = vector.shape_cast %13 : vector<1x512xf32> to vector<1x16x32xf32>
    %15 = vector.shape_cast %0 : vector<1x8x32xf32> to vector<8x32xf32>
    %c0_14 = arith.constant 0 : index
    %c0_15 = arith.constant 0 : index
    %16 = vector.load %arg6[%c0_14, %c0_15] : memref<32x32xf32, #tpu.memory_space<vmem>>, vector<32x32xf32>
    %cst_16 = arith.constant dense<0.000000e+00> : vector<8x32xf32>
    %17 = tpu.matmul %15, %16, %cst_16 {dimension_numbers = #tpu.dot_dimension_numbers<[1], [0], [0], [1], [0, 0, 1, 1], [], []>} : vector<8x32xf32>, vector<32x32xf32>, vector<8x32xf32> -> vector<8x32xf32>
    %c0_17 = arith.constant 0 : index
    %c0_18 = arith.constant 0 : index
    %18 = vector.load %arg7[%c0_17, %c0_18] : memref<1x32xf32, #tpu.memory_space<vmem>>, vector<1x32xf32>
    %19 = vector.broadcast %18 : vector<1x32xf32> to vector<8x32xf32>
    %20 = arith.addf %17, %19 : vector<8x32xf32>
    %21 = vector.shape_cast %20 : vector<8x32xf32> to vector<1x8x32xf32>
    "tpu.trace_start"() <{level = 10 : i32, message = "bed,bnd->ben"}> : () -> ()
    %cst_19 = arith.constant dense<0.000000e+00> : vector<1x16x8xf32>
    %22 = tpu.matmul %14, %21, %cst_19 {dimension_numbers = #tpu.dot_dimension_numbers<[2], [2], [1], [1], [0, 0, 0, 1, 1, 1], [0], [0]>} : vector<1x16x32xf32>, vector<1x8x32xf32>, vector<1x16x8xf32> -> vector<1x16x8xf32>
    "tpu.trace_stop"() : () -> ()
    %cst_20 = arith.constant 0.0883883461 : f32
    %23 = vector.broadcast %cst_20 : f32 to vector<1x16x8xf32>
    %24 = arith.mulf %22, %23 : vector<1x16x8xf32>
    %cst_21 = arith.constant dense<0xFF800000> : vector<1x16xf32>
    %25 = vector.multi_reduction <maximumf>, %24, %cst_21 [2] : vector<1x16x8xf32> to vector<1x16xf32>
    %26 = vector.shape_cast %25 : vector<1x16xf32> to vector<1x16x1xf32>
    %27 = vector.broadcast %26 : vector<1x16x1xf32> to vector<1x16x8xf32>
    %28 = arith.subf %24, %27 : vector<1x16x8xf32>
    %29 = math.exp %28 : vector<1x16x8xf32>
    %cst_22 = arith.constant dense<0.000000e+00> : vector<1x16xf32>
    %30 = vector.multi_reduction <add>, %29, %cst_22 [2] : vector<1x16x8xf32> to vector<1x16xf32>
    %31 = vector.shape_cast %30 : vector<1x16xf32> to vector<1x16x1xf32>
    %32 = tpu.reciprocal %31 {approx = true} : vector<1x16x1xf32> -> vector<1x16x1xf32>
    %33 = arith.mulf %31, %32 : vector<1x16x1xf32>
    %cst_23 = arith.constant 2.000000e+00 : f32
    %34 = vector.broadcast %cst_23 : f32 to vector<1x16x1xf32>
    %35 = arith.subf %34, %33 : vector<1x16x1xf32>
    %36 = arith.mulf %32, %35 : vector<1x16x1xf32>
    %37 = arith.mulf %31, %36 : vector<1x16x1xf32>
    %cst_24 = arith.constant 2.000000e+00 : f32
    %38 = vector.broadcast %cst_24 : f32 to vector<1x16x1xf32>
    %39 = arith.subf %38, %37 : vector<1x16x1xf32>
    %40 = arith.mulf %36, %39 : vector<1x16x1xf32>
    %41 = vector.broadcast %40 : vector<1x16x1xf32> to vector<1x16x8xf32>
    %42 = arith.mulf %29, %41 : vector<1x16x8xf32>
    %c0_25 = arith.constant 0 : index
    %c0_26 = arith.constant 0 : index
    %c0_27 = arith.constant 0 : index
    %43 = vector.load %arg8[%c0_25, %c0_26, %c0_27] : memref<1x16x8xf32, #tpu.memory_space<vmem>>, vector<1x16x8xf32>
    tpu.vector_store %arg8[%c0_25, %c0_26, %c0_27], %42 {strides = array<i32>} : memref<1x16x8xf32, #tpu.memory_space<vmem>>, vector<1x16x8xf32>,
    return
  }
  func.func @transform_0(%arg0: i32) -> (i32, i32, i32) {
    %c0_i32 = arith.constant 0 : i32
    %c0_i32_0 = arith.constant 0 : i32
    %c0_i32_1 = arith.constant 0 : i32
    return %arg0, %c0_i32, %c0_i32_0 : i32, i32, i32
  }
  func.func @transform_1(%arg0: i32) -> (i32, i32) {
    %c0_i32 = arith.constant 0 : i32
    %c0_i32_0 = arith.constant 0 : i32
    %c0_i32_1 = arith.constant 0 : i32
    return %c0_i32, %c0_i32_0 : i32, i32
  }
  func.func @transform_2(%arg0: i32) -> (i32, i32) {
    %c0_i32 = arith.constant 0 : i32
    %c0_i32_0 = arith.constant 0 : i32
    %c0_i32_1 = arith.constant 0 : i32
    return %c0_i32, %c0_i32_0 : i32, i32
  }
  func.func @transform_3(%arg0: i32) -> (i32, i32) {
    %c0_i32 = arith.constant 0 : i32
    %c0_i32_0 = arith.constant 0 : i32
    %c0_i32_1 = arith.constant 0 : i32
    return %c0_i32, %c0_i32_0 : i32, i32
  }
  func.func @transform_4(%arg0: i32) -> (i32, i32) {
    %c0_i32 = arith.constant 0 : i32
    %c0_i32_0 = arith.constant 0 : i32
    %c0_i32_1 = arith.constant 0 : i32
    return %c0_i32, %c0_i32_0 : i32, i32
  }
  func.func @transform_5(%arg0: i32) -> (i32, i32) {
    %c0_i32 = arith.constant 0 : i32
    %c0_i32_0 = arith.constant 0 : i32
    %c0_i32_1 = arith.constant 0 : i32
    return %c0_i32, %c0_i32_0 : i32, i32
  }
  func.func @transform_6(%arg0: i32) -> (i32, i32) {
    %c0_i32 = arith.constant 0 : i32
    %c0_i32_0 = arith.constant 0 : i32
    %c0_i32_1 = arith.constant 0 : i32
    return %c0_i32, %c0_i32_0 : i32, i32
  }
  func.func @transform_7(%arg0: i32) -> (i32, i32, i32) {
    %c0_i32 = arith.constant 0 : i32
    %c0_i32_0 = arith.constant 0 : i32
    %c0_i32_1 = arith.constant 0 : i32
    return %arg0, %c0_i32, %c0_i32_0 : i32, i32, i32
  }
}

</mosaic_0001>

<bundles_post_ra>
// kernel: tpu_custom_call.1
= control target key start
LH: loop header
LB: loop body
LE: loop exit
PB: predicated region body
PF: predicated region fallthrough
CT: control target
= control target key end

     0   :  { %12 = vsyncpa [#allocation3], 0  ;;  %s1900_s0 = inlined_call_operand.hbm [shape: f32[2,8,32], index: 0, kind: input, shape index: {}]   ;;  %s1901_s1 = inlined_call_operand.hbm [shape: f32[1,512], index: 1, kind: input, shape index: {}]   ;;  %s1902_s2 = inlined_call_operand.hbm [shape: f32[32,512], index: 2, kind: input, shape index: {}]   ;;  %s1903_s3 = inlined_call_operand.hbm [shape: f32[32,512], index: 3, kind: input, shape index: {}]   ;;  %s1904_s4 = inlined_call_operand.vmem [shape: f32[1,512], index: 4, kind: input, shape index: {}]   ;;  %s1905_s5 = inlined_call_operand.hbm [shape: f32[32,32], index: 5, kind: input, shape index: {}]   ;;  %s1906_s6 = inlined_call_operand.vmem [shape: f32[1,32], index: 6, kind: input, shape index: {}]   ;;  %s1907_s7 = inlined_call_operand.vmem [shape: f32[2,16,8], index: 7, kind: output, shape index: {}]  }
   0x1   :  { %14 = vsyncpa [#allocation3 + $0x1], 0 }
   0x2   :  { %15 = vsyncpa [#allocation5], 0 }
   0x3   :  { %16 = vsyncpa [#allocation8], 0  ;;  %s1632_s24 = smov 0   ;;  %s1634_s25 = smov 0  }
   0x4   :  { %s1636_s26 = smov 0   ;;  %s1638_s27 = smov 0  }
   0x5 LB: > { %s1575_s28 = smov [#allocation4]   ;;  %s1653_s30 = sadd.s32 4294967295, %s1573_s27   ;;  %s1573_s27 = sphi %s1638_s27, %s1924_s27   ;;  %s1569_s26 = sphi %s1636_s26, %s1923_s26   ;;  %s1565_s25 = sphi %s1634_s25, %s1922_s25   ;;  %s1561_s24 = sphi %s1632_s24, %s1921_s24  }
   0x6   : > { %s218_s29 = sshll.u32 %s1575_s28, 4  ;;  %p1195_p0 = scmp.ge.s32.totalorder %s1573_s27, 1  ;;  %s219_s29 = int_to_ptr.vmem [resolvable:$true] %s218_s29 }
   0x7   : > { %p1908_p1 = scmp.eq.s32.totalorder %s1653_s30, 0  ;;  %p205_p2 = scmp.lt.s32.totalorder %s1573_s27, 3 }
   0x8   : > { %s1576_s9 = smov [#allocation7]   ;;  %s1577_s12 = smov [#allocation6]  }
   0x9   : > { %p1658_p3 = pnand %p1195_p0, %p205_p2  ;;  %s241_s10 = sshll.u32 %s1576_s9, 4  ;;  %s1670_s10 = int_to_ptr.vmem [resolvable:$true] %s241_s10 }
   0xa   : > { %s228_s13 = sshll.u32 %s1577_s12, 4  ;;  %s1389_s16 = scalar_lea.hbm %s1901_s1, 64  ;;  %s1672_s13 = int_to_ptr.vmem [resolvable:$true] %s228_s13 }
   0xb   : > { %s1910_s8 = scalar_select %p1658_p3, 1, 0 }
   0xc   : > { %p1307_p4 = pneg %p1658_p3  ;;  %p1390_p6 = scmp.ne.s32.totalorder %s1901_s1, %s1389_s16 }
   0xd   : > { %p1396_p10 = scmp.lt.u32.totalorder %s1389_s16, %s1901_s1 }
   0xe   : > { %p1666_p5 = pnand %p1307_p4, %p1908_p1 }
  0x10   : > { %p1682_p7 = pneg %p1666_p5 }
  0x12   : > { %p1392_p8 = pnand %p1682_p7, %p1390_p6 }
  0x14   : > { %p1393_p9 = pneg %p1392_p8 }
  0x16   : > { %p1398_p11 = pnand %p1396_p10, %p1393_p9 }
  0x18   : > { %1401 = shalt.err (!%p1398_p11)
}
  0x19   : > { %s1402_s22 = scalar_lea.vmem %s219_s29, 64  ;;  %p1410_p2 = scmp.lt.s32.totalorder %s219_s29, %s219_s29 }
  0x1a   : > { %p1403_p12 = scmp.ne.s32.totalorder %s219_s29, %s1402_s22  ;;  %p1411_p4 = scmp.lt.s32.totalorder %s1402_s22, %s1402_s22 }
  0x1c   : > { %p1405_p13 = pnand %p1403_p12, %p1682_p7  ;;  %p1412_p1 = por %p1411_p4, %p1410_p2 }
  0x1e   : > { %p1406_p0 = pneg %p1405_p13 }
  0x20   : > { %p1413_p3 = pnand %p1412_p1, %p1406_p0 }
  0x22   : > { %1416 = shalt.err (!%p1413_p3)
}
  0x23   : > { %1310 = dma.hbm_to_vmem [thread:$0]  (!%p1666_p5), %s1901_s1, 64, %s219_s29, [#allocation5]  }
  0x24   : > { %s1417_s14 = scalar_lea.hbm %s1903_s3, 2048 }
  0x25   : > { %p1418_p6 = scmp.ne.s32.totalorder %s1903_s3, %s1417_s14  ;;  %p1424_p1 = scmp.lt.u32.totalorder %s1417_s14, %s1903_s3 }
  0x27   : > { %p1420_p8 = pnand %p1418_p6, %p1682_p7 }
  0x29   : > { %p1421_p9 = pneg %p1420_p8 }
  0x2b   : > { %p1426_p3 = pnand %p1424_p1, %p1421_p9 }
  0x2d   : > { %1429 = shalt.err (!%p1426_p3)
}
  0x2e   : > { %s1430_s29 = scalar_lea.vmem %s1670_s10, 2048  ;;  %p1438_p13 = scmp.lt.s32.totalorder %s1670_s10, %s1670_s10 }
  0x2f   : > { %p1431_p10 = scmp.ne.s32.totalorder %s1670_s10, %s1430_s29  ;;  %p1439_p0 = scmp.lt.s32.totalorder %s1430_s29, %s1430_s29 }
  0x31   : > { %p1433_p11 = pnand %p1431_p10, %p1682_p7  ;;  %p1440_p2 = por %p1439_p0, %p1438_p13 }
  0x33   : > { %p1434_p12 = pneg %p1433_p11 }
  0x35   : > { %p1441_p4 = pnand %p1440_p2, %p1434_p12 }
  0x37   : > { %1444 = shalt.err (!%p1441_p4)
}
  0x38   : > { %s1578_s20 = smov 512   ;;  %s1579_s21 = smov 32  }
  0x39   : > { %1316 = dma.hbm_to_vmem [thread:$0]  (!%p1666_p5), %s1903_s3, 2048, %s1670_s10, [#allocation8], %s1578_s20, %s1578_s20, %s1579_s21  }
  0x3a   : > { %s1445_s12 = scalar_lea.hbm %s1902_s2, 2048 }
  0x3b   : > { %p1446_p6 = scmp.ne.s32.totalorder %s1902_s2, %s1445_s12  ;;  %p1452_p1 = scmp.lt.u32.totalorder %s1445_s12, %s1902_s2 }
  0x3d   : > { %p1448_p8 = pnand %p1446_p6, %p1682_p7 }
  0x3f   : > { %p1449_p9 = pneg %p1448_p8 }
  0x41   : > { %p1454_p3 = pnand %p1452_p1, %p1449_p9 }
  0x43   : > { %1457 = shalt.err (!%p1454_p3)
}
  0x44   : > { %s1458_s10 = scalar_lea.vmem %s1672_s13, 2048  ;;  %p1466_p13 = scmp.lt.s32.totalorder %s1672_s13, %s1672_s13 }
  0x45   : > { %p1459_p10 = scmp.ne.s32.totalorder %s1672_s13, %s1458_s10  ;;  %p1467_p0 = scmp.lt.s32.totalorder %s1458_s10, %s1458_s10 }
  0x47   : > { %p1461_p11 = pnand %p1459_p10, %p1682_p7  ;;  %p1468_p2 = por %p1467_p0, %p1466_p13 }
  0x49   : > { %p1462_p12 = pneg %p1461_p11 }
  0x4b   : > { %p1469_p4 = pnand %p1468_p2, %p1462_p12 }
  0x4d   : > { %1472 = shalt.err (!%p1469_p4)
}
  0x4e   : > { %1313 = dma.hbm_to_vmem [thread:$0]  (!%p1666_p5), %s1902_s2, 2048, %s1672_s13, [#allocation5], %s1578_s20, %s1578_s20, %s1579_s21  }
  0x4f   : > { %s1580_s22 = smov [#allocation9]   ;;  %s1473_s12 = scalar_lea.hbm %s1905_s5, 512 }
  0x50   : > { %s257_s23 = sshll.u32 %s1580_s22, 4  ;;  %p1474_p6 = scmp.ne.s32.totalorder %s1905_s5, %s1473_s12  ;;  %s258_s23 = int_to_ptr.vmem [resolvable:$true] %s257_s23 }
  0x51   : > { %p1480_p1 = scmp.lt.u32.totalorder %s1473_s12, %s1905_s5 }
  0x52   : > { %p1476_p8 = pnand %p1474_p6, %p1682_p7 }
  0x54   : > { %p1477_p9 = pneg %p1476_p8 }
  0x56   : > { %p1482_p3 = pnand %p1480_p1, %p1477_p9 }
  0x58   : > { %1485 = shalt.err (!%p1482_p3)
}
  0x59   : > { %s1486_s13 = scalar_lea.vmem %s258_s23, 512  ;;  %p1494_p13 = scmp.lt.s32.totalorder %s258_s23, %s258_s23 }
  0x5a   : > { %p1487_p10 = scmp.ne.s32.totalorder %s258_s23, %s1486_s13  ;;  %p1495_p0 = scmp.lt.s32.totalorder %s1486_s13, %s1486_s13 }
  0x5c   : > { %p1489_p11 = pnand %p1487_p10, %p1682_p7  ;;  %p1496_p2 = por %p1495_p0, %p1494_p13 }
  0x5e   : > { %p1490_p12 = pneg %p1489_p11 }
  0x60   : > { %p1497_p4 = pnand %p1496_p2, %p1490_p12 }
  0x62   : > { %1500 = shalt.err (!%p1497_p4)
}
  0x63   : > { %s1581_s20 = smov 128   ;;  %s1582_s19 = smov 8  }
  0x64   : > { %1319 = dma.hbm_to_vmem [thread:$0]  (!%p1666_p5), %s1905_s5, 512, %s258_s23, [#allocation8], %s1581_s20, %s1581_s20, %s1582_s19  }
  0x65   : > { %s1763_s18 = sadd.s32 1, %s1573_s27   ;;  %s29_s29 = sadd.s32 1, %s1569_s26 }
  0x66   : > { %s26_s22 = ssub.s32 %s1573_s27, %s1763_s18  ;;  %p36_p7 = scmp.ne.s32.totalorder %s1569_s26, %s1565_s25 }
  0x67   : > { %p27_p6 = scmp.eq.s32.totalorder %s26_s22, 0  ;;  %p37_p8 = scmp.eq.s32.totalorder %s1573_s27, 0 }
  0x68   : > { %p42_p9 = scmp.ne.s32.totalorder %s1565_s25, %s1561_s24  ;;  %p1328_p1 = scmp.lt.s32.totalorder %s1573_s27, 2 }
  0x69   : > { %s1775_s28 = scalar_select %p27_p6, %s1569_s26, %s29_s29  }
  0x6a   : > { %p38_p3 = por %p37_p8, %p36_p7  ;;  %p1913_p10 = scmp.eq.s32.totalorder %s1653_s30, 0 }
  0x6b   : > { %s274_s9 = sand.u32 1, %s1569_s26   ;;  %s1202_s23 = sshll.u32 %s1573_s27, 7 }
  0x6c   : > { %p1779_p11 = por %p1913_p10, %p42_p9  ;;  %s1201_s12 = sshll.u32 %s274_s9, 3 }
  0x6d   : > { %s1788_s16 = scalar_lea.hbm %s1900_s0, %s1202_s23  ;;  %s278_s24 = scalar_lea.vmem [#allocation2], %s1201_s12 }
  0x6e   : > { %s285_s17 = sshll.u32 %s278_s24, 4  ;;  %p1790_p5 = pnand %p1328_p1, %p38_p3  ;;  %s1794_s17 = int_to_ptr.vmem [resolvable:$true] %s285_s17 }
  0x6f   : > { %s275_s27 = scalar_lea.sflag [#allocation3], %s274_s9  ;;  %s1501_s20 = scalar_lea.hbm %s1788_s16, 128 }
  0x70   : > { %p1502_p12 = scmp.ne.s32.totalorder %s1788_s16, %s1501_s20  ;;  %p1503_p13 = pneg %p1790_p5 }
  0x71   : > { %s1506_s10 = scalar_lea.hbm %s1900_s0, 256  ;;  %p1507_p4 = scmp.lt.u32.totalorder %s1788_s16, %s1900_s0 }
  0x72   : > { %p1504_p0 = pnand %p1503_p13, %p1502_p12  ;;  %p1508_p7 = scmp.lt.u32.totalorder %s1506_s10, %s1501_s20 }
  0x73   : > { %p1510_p8 = scmp.lt.u32.totalorder %s1501_s20, %s1788_s16 }
  0x74   : > { %p1505_p2 = pneg %p1504_p0  ;;  %p1509_p6 = por %p1508_p7, %p1507_p4 }
  0x76   : > { %p1511_p9 = por %p1510_p8, %p1509_p6 }
  0x78   : > { %p1512_p1 = pnand %p1511_p9, %p1505_p2 }
  0x7a   : > { %1515 = shalt.err (!%p1512_p1)
}
  0x7b   : > { %s1516_s9 = scalar_lea.vmem %s1794_s17, 128  ;;  %s1583_s23 = smov [#allocation2]  }
  0x7c   : > { %p1517_p3 = scmp.ne.s32.totalorder %s1794_s17, %s1516_s9  ;;  %s1521_s12 = sshll.u32 %s1583_s23, 4  ;;  %s1522_s12 = int_to_ptr.vmem [resolvable:$false] %s1521_s12 }
  0x7d   : > { %s1523_s14 = scalar_lea.vmem %s1522_s12, 256  ;;  %p1524_p0 = scmp.lt.s32.totalorder %s1794_s17, %s1522_s12 }
  0x7e   : > { %p1519_p10 = pnand %p1517_p3, %p1503_p13  ;;  %p1525_p4 = scmp.lt.s32.totalorder %s1523_s14, %s1516_s9 }
  0x80   : > { %p1520_p12 = pneg %p1519_p10  ;;  %p1526_p7 = por %p1525_p4, %p1524_p0 }
  0x82   : > { %p1527_p6 = pnand %p1526_p7, %p1520_p12 }
  0x84   : > { %1530 = shalt.err (!%p1527_p6)
}
  0x85   : > { %1323 = dma.hbm_to_vmem [thread:$0]  (!%p1790_p5), %s1788_s16, 128, %s1794_s17, %s275_s27  }
  0x86   : > { %p1916_p2 = scmp.ne.s32.totalorder %s1910_s8, 0 }
  0x87   : > { %s296_s15 = sand.u32 (!%p1916_p2), 1, %s1565_s25  }
  0x88   : > { %294 = sbr.rel (%p1916_p2) target bundleno = 1087 (0x43f), region = 48  ;;  %s1824_s24 = sshll.u32 (!%p1916_p2), %s296_s15, 3 }
  0x89   : > { %s297_s20 = scalar_lea.sflag (!%p1916_p2), [#allocation3], %s296_s15  ;;  %s300_s19 = scalar_lea.vmem (!%p1916_p2), [#allocation2], %s1824_s24 }
  0x8f   : > { %1548 = dma.done.wait (%p1779_p11), %s297_s20, 128  }
  0x90   : > { %1550 = vsyncadd (%p1779_p11), %s297_s20, 4294967168  ;;  %p1917_p13 = scmp.eq.s32.totalorder %s1653_s30, 0 }
  0x92   : > { %1552 = dma.done.wait (%p1917_p13), [#allocation5], 2112   ;;  %p1918_p5 = pmov %p1917_p13 }
  0x94   : > { %1554 = vsyncadd (%p1918_p5), [#allocation5], 4294965184  ;;  %p1919_p8 = pmov %p1918_p5 }
  0x95   : > { %p1920_p9 = pmov %p1918_p5 }
  0x96   : > { %1556 = dma.done.wait (%p1919_p8), [#allocation8], 2560  }
  0x97   : > { %1558 = vsyncadd (%p1920_p9), [#allocation8], 4294964736  ;;  %v1584_v0 = vmov 0.0   ;;  %v387_v1 = vld [vmem:[#allocation7 + $0x8] sm:$0xff]  ;;  %v386_v3 = vld [vmem:[#allocation7] sm:$0xff]  ;;  %vm353_vm0 = vcmask 261120  }
  0x98   : > { %469 = vmatprep.mubr.f32.mxu0 %v1584_v0  ;;  %540 = vmatprep.mubr.f32.mxu1 %v1584_v0  ;;  %v391_v2 = vld [vmem:[#allocation7 + $0x28] sm:$0xff]  ;;  %v390_v5 = vld [vmem:[#allocation7 + $0x20] sm:$0xff]  ;;  %v389_v6 = vld [vmem:[#allocation7 + $0x18] sm:$0xff]  ;;  %vm1586_vm1 = vmmov 0   ;;  %s1587_s16 = smov 32   ;;  %s1588_s17 = smov 96  }
  0x99   : > { %v1247_v4 = vpack.c.bf16 %v391_v2, %v387_v1  ;;  %v393_v7 = vld [vmem:[#allocation7 + $0x38] sm:$0xff]  ;;  %v1249_v8 = vpack.c.bf16 %v390_v5, %v386_v3  ;;  %v388_v10 = vld [vmem:[#allocation7 + $0x10] sm:$0xff]  ;;  %v395_v12 = vld [vmem:[#allocation7 + $0x48] sm:$0xff]  ;;  %v1585_v5 = vmov 0.0|0.0   ;;  %s1589_s13 = smov 64   ;;  %vm1052_vm2 = vcmask 64512  }
  0x9a   : > { %v1255_v9 = vpack.c.bf16 %v393_v7, %v389_v6  ;;  %v392_v11 = vld [vmem:[#allocation7 + $0x30] sm:$0xff]  ;;  %v399_v14 = vld [vmem:[#allocation7 + $0x68] sm:$0xff]  ;;  %v394_v15 = vld [vmem:[#allocation7 + $0x40] sm:$0xff]  ;;  %p347_p11 = scmp.lt.s32.totalorder %s1653_s30, 1 }
  0x9b   : > { %1248 = vmatprep.subr.bf16.mxu0 %v1247_v4  ;;  %v1257_v13 = vpack.c.bf16 %v392_v11, %v388_v10  ;;  %v398_v16 = vld [vmem:[#allocation7 + $0x60] sm:$0xff]  ;;  %v1251_v17 = vpack.c.bf16 %v399_v14, %v395_v12  ;;  %v397_v19 = vld [vmem:[#allocation7 + $0x58] sm:$0xff]  ;;  %v396_v21 = vld [vmem:[#allocation7 + $0x50] sm:$0xff] }
  0x9c   : > { %1250 = vmatpush1.bf16.msra.mxu0 %v1249_v8  ;;  %1256 = vmatprep.subr.bf16.mxu1 %v1255_v9  ;;  %v1253_v18 = vpack.c.bf16 %v398_v16, %v394_v15  ;;  %v401_v20 = vld [vmem:[#allocation7 + $0x78] sm:$0xff]  ;;  %v400_v23 = vld [vmem:[#allocation7 + $0x70] sm:$0xff]  ;;  %v371_v24 = vld [vmem:[#allocation6 + $0x8] sm:$0xff]  ;;  %v694_v9 = vlaneseq  ;;  %s1926_s30 = smov (!%p347_p11, %s1653_s30), 1 }
  0x9d   : > { %1258 = vmatpush1.bf16.msra.mxu1 %v1257_v13  ;;  %v1259_v22 = vpack.c.bf16 %v401_v20, %v397_v19  ;;  %v375_v25 = vld [vmem:[#allocation6 + $0x28] sm:$0xff]  ;;  %1252 = vmatprep.subr.bf16.mxu0 %v1251_v17  ;;  %v1261_v26 = vpack.c.bf16 %v400_v23, %v396_v21  ;;  %v373_v31 = vld [vmem:[#allocation6 + $0x18] sm:$0xff]  ;;  %v370_v40 = vld [vmem:[#allocation6] sm:$0xff]  ;;  %s1222_s10 = sshll.u32 %s1926_s30, 4 }
  0x9e   : > { %v1263_v27 = vpack.c.bf16 %v375_v25, %v371_v24  ;;  %v1843_v28 = vld [vmem:[%s300_s19] sm:$0xff]  ;;  %v374_v41 = vld [vmem:[#allocation6 + $0x20] sm:$0xff]  ;;  %v1858_v10 = vshrl.u32 %v694_v9, 7  ;;  %v718_v14 = vld [vmem:[#allocation4] sm:$0xf]  ;;  %s351_s9 = scalar_lea.vmem %s1907_s7, %s1222_s10 }
  0x9f   : > { %1260 = vmatprep.subr.bf16.mxu1 %v1259_v22  ;;  %v354_v29 = vsel %vm353_vm0, %v1843_v28, 0.0  ;;  %v363_v30 = vsel %vm353_vm0, %v1843_v28, -inf  ;;  %v377_v32 = vld [vmem:[#allocation6 + $0x38] sm:$0xff]  ;;  %v372_v43 = vld [vmem:[#allocation6 + $0x10] sm:$0xff]  ;;  %v379_v45 = vld [vmem:[#allocation6 + $0x48] sm:$0xff]  ;;  %v1265_v52 = vpack.c.bf16 %v374_v41, %v370_v40 }
  0xa0   : > { %1254 = vmatpush1.bf16.msra.mxu0 %v1253_v18  ;;  %v355_v33 = vrot.slane %v354_v29, 4  ;;  %v364_v34 = vrot.slane %v363_v30, 4  ;;  %v1271_v35 = vpack.c.bf16 %v377_v32, %v373_v31  ;;  %v376_v44 = vld [vmem:[#allocation6 + $0x30] sm:$0xff]  ;;  %v383_v47 = vld [vmem:[#allocation6 + $0x68] sm:$0xff]  ;;  %v381_v48 = vld [vmem:[#allocation6 + $0x58] sm:$0xff]  ;;  %v696_v11 = vsub.s32 0, %v1858_v10 }
  0xa1   : > { %1262 = vmatpush1.bf16.msra.mxu1 %v1261_v26  ;;  %1264 = vmatprep.subr.bf16.mxu0 %v1263_v27  ;;  %v385_v49 = vld [vmem:[#allocation6 + $0x78] sm:$0xff]  ;;  %v1273_v53 = vpack.c.bf16 %v376_v44, %v372_v43  ;;  %v378_v54 = vld [vmem:[#allocation6 + $0x40] sm:$0xff]  ;;  %v1267_v56 = vpack.c.bf16 %v383_v47, %v379_v45  ;;  %v380_v59 = vld [vmem:[#allocation6 + $0x50] sm:$0xff]  ;;  %v704_v13 = vsub.s32 2, %v1858_v10  ;;  %v700_v17 = vsub.s32 1, %v1858_v10 }
  0xa2   : > { %v365_v36 = vmax.f32 %v363_v30, %v364_v34  ;;  %1272 = vmatprep.subr.bf16.mxu1 %v1271_v35  ;;  %v356_v37 = vadd.f32 %v355_v33, %v354_v29  ;;  %v382_v57 = vld [vmem:[#allocation6 + $0x60] sm:$0xff]  ;;  %v1275_v58 = vpack.c.bf16 %v385_v49, %v381_v48  ;;  %v384_v60 = vld [vmem:[#allocation6 + $0x70] sm:$0xff]  ;;  %v883_v2 = vld [vmem:[#allocation9 + $0x8] sm:$0xff]  ;;  %v723_v16 = vrot.slane %v718_v14, %v696_v11 }
  0xa3   : > { %v1269_v62 = vpack.c.bf16 %v382_v57, %v378_v54  ;;  %v1277_v63 = vpack.c.bf16 %v384_v60, %v380_v59  ;;  %v882_v1 = vld [vmem:[#allocation9] sm:$0xff]  ;;  %v884_v6 = vld [vmem:[#allocation9 + $0x10] sm:$0xff]  ;;  %v885_v7 = vld [vmem:[#allocation9 + $0x18] sm:$0xff]  ;;  %v731_v25 = vrot.slane %v718_v14, %v704_v13  ;;  %v727_v29 = vrot.slane %v718_v14, %v700_v17 }
  0xa4   : > { %v366_v38 = vrot.slane %v365_v36, 2  ;;  %v357_v39 = vrot.slane %v356_v37, 2  ;;  %v1280_v4 = vpack.c.bf16 %v883_v2, %v882_v1  ;;  %v1283_v8 = vpack.c.bf16 %v885_v7, %v884_v6  ;;  %v692_v12 = vld [vmem:[%s1904_s4] sm:$0xf] }
  0xa5   : > { %v697_v15 = vrot.slane %v692_v12, %v696_v11  ;;  %v701_v26 = vrot.slane %v692_v12, %v700_v17  ;;  %v708_v30 = vsub.s32 3, %v1858_v10  ;;  %v1215_v33 = vld [vmem:[%s1906_s6] ss:$0 sm:$0xff]  ;;  %v1591_v49 = vmov 1934713408  }
  0xa6   : > { %v367_v42 = vmax.f32 %v365_v36, %v366_v38  ;;  %v358_v46 = vadd.f32 %v357_v39, %v356_v37 }
  0xa7   : > { %v709_v32 = vrot.slane %v692_v12, %v708_v30  ;;  %v735_v36 = vrot.slane %v718_v14, %v708_v30 }
  0xa8   : > { %v368_v50 = vrot.slane %v367_v42, 1  ;;  %v359_v51 = vrot.slane %v358_v46, 1 }
  0xaa   : > { %v369_v55 = vmax.f32 %v367_v42, %v368_v50  ;;  %v360_v61 = vadd.f32 %v359_v51, %v358_v46  ;;  %v1590_v42 = vmov 1983009808   ;;  %v818_v50 = vunpack.c.l.s4 %v1591_v49 }
  0xab   : > { %v786_v43 = vunpack.c.l.s4 %v1590_v42 }
  0xac   : > { %1211 = vmatmul.mubr.msk.f32.vlgmr.msra.gmra.mrb[0].mxu0 %vm353_vm0, %v369_v55  ;;  %1212 = vmatmul.mubr.msk.f32.vlgmr.msra.gmra.mrb[0].mxu1 %vm353_vm0, %v369_v55  ;;  %v362_v3 = vmul.f32 0.125, %v360_v61 }
  0xad   : > { %1266 = vmatpush1.bf16.msra.mxu0 %v1265_v52  ;;  %1274 = vmatpush1.bf16.msra.mxu1 %v1273_v53  ;;  %v787_v46 = vunpack.c.0.s8 %v786_v43 }
  0xae   : > { %1268 = vmatprep.subr.bf16.mxu0 %v1267_v56  ;;  %1276 = vmatprep.subr.bf16.mxu1 %v1275_v58  ;;  %v819_v56 = vunpack.c.0.s8 %v818_v50 }
  0xaf   : > { %614 = vmatprep.mubr.f32.mxu0 %v1584_v0  ;;  %685 = vmatprep.mubr.f32.mxu1 %v1584_v0  ;;  %v790_v52 = vsub.s32 %v787_v46, %v1858_v10 }
  0xb0   : > { %v822_v2 = vsub.s32 %v819_v56, %v1858_v10 }
  0xb1   : > { %1270 = vmatpush1.bf16.msra.mxu0 %v1269_v62  ;;  %1278 = vmatpush1.bf16.msra.mxu1 %v1277_v63 }
  0xb2   : > { %1279 = vmatprep.subr.bf16.mxu0 %v1585_v5 }
  0xb4   : > { %1213 = vmatmul.mubr.msk.f32.vlgmr.msra.gmra.mrb[0].mxu0 %vm353_vm0, %v362_v3  ;;  %1214 = vmatmul.mubr.msk.f32.vlgmr.msra.gmra.mrb[0].mxu1 %vm353_vm0, %v362_v3 }
  0xb5   : > { %1281 = vmatpush3.bf16.msra.mxu0 %v1280_v4  ;;  %1239 = vmatprep.mubr.msk.f32.mxu0 %vm1586_vm1, %v1584_v0  ;;  %v705_v0 = vrot.slane %v692_v12, %v704_v13 }
  0xb6   : > { %1282 = vmatprep.subr.bf16.mxu0 %v1585_v5 }
  0xb9   : > { %1284 = vmatpush3.bf16.msra.mxu0 %v1283_v8 }
  0xbc   : > { %1240 = vmatmul.mubr.msk.f32.vlgmr.msra.gmra.mrb[2].mxu0 %vm353_vm0, %v1843_v28 }
 0x187   : > { %v616_v18 = vpop.f32.mrb[0].mxu0  ;;  %v687_v19 = vpop.f32.mrb[0].mxu1 }
 0x188   : > { %v714_v20 = vadd.f32 %v697_v15, %v616_v18  ;;  %v618_v21 = vpop.f32.mrb[1].mxu0  ;;  %v689_v22 = vpop.f32.mrb[1].mxu1  ;;  %v716_v24 = vadd.f32 %v705_v0, %v687_v19 }
 0x189   : > { %v715_v28 = vadd.f32 %v701_v26, %v618_v21  ;;  %v717_v35 = vadd.f32 %v709_v32, %v689_v22 }
 0x18a   : > { %v740_v23 = vadd.f32 %v723_v16, %v714_v20  ;;  %v742_v27 = vadd.f32 %v731_v25, %v716_v24 }
 0x18b   : > { %v741_v31 = vadd.f32 %v727_v29, %v715_v28  ;;  %v743_v39 = vadd.f32 %v735_v36, %v717_v35 }
 0x18c   : > { %751 = vrot.lane.b32.xlu1 %v740_v23, %s1587_s16  ;;  %745 = vrot.lane.b32.xlu0 %v740_v23, %s1588_s17 }
 0x18f   : > { %v962_v34 = vpop.f32.mrb[2].mxu0 }
 0x190   : > { %768 = vrot.lane.b32.xlu1 %v742_v27, %s1589_s13  ;;  %748 = vrot.lane.b32.xlu0 %v740_v23, %s1589_s13  ;;  %v963_v37 = vadd.f32 %v1215_v33, %v962_v34  ;;  %v1241_v38 = vpop.f32.mrb[3].mxu0 }
 0x192   : > { %1242 = vmatprep.subr.msk.mxu1 %vm353_vm0, %v963_v37 }
 0x193   : > { %1243 = vmatpush3.xpose.msk.msra.mxu1 %vm353_vm0, %v963_v37 }
 0x194   : > { %765 = vrot.lane.b32.xlu0 %v742_v27, %s1588_s17  ;;  %755 = vrot.lane.b32.xlu1 %v741_v31, %s1588_s17 }
 0x198   : > { %771 = vrot.lane.b32.xlu0 %v742_v27, %s1587_s16  ;;  %761 = vrot.lane.b32.xlu1 %v741_v31, %s1587_s16 }
 0x19c   : > { %758 = vrot.lane.b32.xlu0 %v741_v31, %s1589_s13  ;;  %775 = vrot.lane.b32.xlu1 %v743_v39, %s1588_s17 }
 0x1a0   : > { %778 = vrot.lane.b32.xlu0 %v743_v39, %s1589_s13  ;;  %781 = vrot.lane.b32.xlu1 %v743_v39, %s1587_s16 }
 0x1fe   : > { %v752_v40 = vpop.permute.xlu1 %751  ;;  %v746_v41 = vpop.permute.xlu0 %745 }
 0x1ff   : > { %v792_v53 = vcombine.low %v746_v41, %v752_v40 }
 0x201   : > { %v799_v60 = vrot.slane %v792_v53, %v790_v52 }
 0x202   : > { %v769_v44 = vpop.permute.xlu1 %768  ;;  %v749_v45 = vpop.permute.xlu0 %748 }
 0x203   : > { %v784_v51 = vcombine.low %v740_v23, %v749_v45  ;;  %v833_v63 = vcombine.low %v742_v27, %v769_v44 }
 0x205   : > { %v791_v57 = vrot.slane %v784_v51, %v790_v52  ;;  %v840_v9 = vrot.slane %v833_v63, %v790_v52 }
 0x206   : > { %v766_v47 = vpop.permute.xlu0 %765  ;;  %v756_v48 = vpop.permute.xlu1 %755 }
 0x207   : > { %v816_v3 = vcombine.low %v791_v57, %v799_v60 }
 0x209   : > { %v823_v14 = vrot.slane %v816_v3, %v822_v2 }
 0x20a   : > { %v772_v54 = vpop.permute.xlu0 %771  ;;  %v762_v55 = vpop.permute.xlu1 %761 }
 0x20b   : > { %v841_v58 = vcombine.low %v766_v47, %v772_v54  ;;  %v808_v59 = vcombine.low %v756_v48, %v762_v55 }
 0x20d   : > { %v848_v4 = vrot.slane %v841_v58, %v790_v52  ;;  %v815_v5 = vrot.slane %v808_v59, %v790_v52 }
 0x20e   : > { %v759_v61 = vpop.permute.xlu0 %758  ;;  %v776_v62 = vpop.permute.xlu1 %775 }
 0x20f   : > { %v800_v1 = vcombine.low %v741_v31, %v759_v61  ;;  %v865_v15 = vcombine.low %v840_v9, %v848_v4 }
 0x211   : > { %v807_v6 = vrot.slane %v800_v1, %v790_v52  ;;  %v872_v20 = vrot.slane %v865_v15, %v822_v2 }
 0x212   : > { %v779_v7 = vpop.permute.xlu0 %778  ;;  %v782_v8 = vpop.permute.xlu1 %781 }
 0x213   : > { %v824_v11 = vcombine.low %v807_v6, %v815_v5  ;;  %v849_v12 = vcombine.low %v743_v39, %v779_v7  ;;  %v857_v13 = vcombine.low %v776_v62, %v782_v8 }
 0x215   : > { %v831_v16 = vrot.slane %v824_v11, %v822_v2  ;;  %v856_v0 = vrot.slane %v849_v12, %v790_v52  ;;  %v864_v17 = vrot.slane %v857_v13, %v790_v52 }
 0x217   : > { %v873_v18 = vcombine.low %v856_v0, %v864_v17  ;;  %v832_v19 = vcombine.low %v823_v14, %v831_v16 }
 0x219   : > { %v880_v21 = vrot.slane %v873_v18, %v822_v2  ;;  %1244 = vmatprep.mubr.msk.f32.mxu1 %vm353_vm0, %v832_v19 }
 0x21b   : > { %v881_v10 = vcombine.low %v872_v20, %v880_v21 }
 0x21d   : > { %1245 = vmatmul.mubr.msk.f32.vlgmr.msra.gmra.mrb[2].mxu1 %vm353_vm0, %v881_v10 }
 0x2f0   : > { %v1246_v22 = vpop.f32.mrb[2].mxu1 }
 0x2f1   : > { %v1051_v23 = vmul.f32 0.088388346, %v1246_v22  ;;  %v1041_v24 = vpop.f32.mrb[3].mxu1 }
 0x2f2   : > { %v1050_v25 = vmul.f32 0.088388346, %v1041_v24 }
 0x2f3   : > { %v1056_v26 = vsel %vm1052_vm2, %v1051_v23, -inf }
 0x2f4   : > { %1057 = vmax.xlane.f32.xlu1 %v1056_v26  ;;  %v1053_v27 = vsel %vm1052_vm2, %v1050_v25, -inf }
 0x2f5   : > { %1054 = vmax.xlane.f32.xlu0 %v1053_v27 }
 0x381   : > { %v1058_v28 = vpop.xlane.xlu1 %1057 }
 0x382   : > { %v1060_v29 = vsub.f32 %v1051_v23, %v1058_v28  ;;  %v1055_v30 = vpop.xlane.xlu0 %1054 }
 0x383   : > { %v1059_v31 = vsub.f32 %v1050_v25, %v1055_v30 }
 0x384   : > { %v1063_v32 = vmul.f32 1.442695, %v1060_v29 }
 0x385   : > { %v1061_v33 = vmul.f32 1.442695, %v1059_v31 }
 0x387   : > { %1381 = vpow2.f32 %v1061_v33 }
 0x388   : > { %1383 = vpow2.f32 %v1063_v32 }
 0x391   : > { %v1382_v34 = vpop.eup %1381 }
 0x392   : > { %v1065_v35 = vsel %vm1052_vm2, %v1382_v34, 0.0  ;;  %v1384_v36 = vpop.eup %1383 }
 0x393   : > { %1066 = vadd.xlane.f32.xlu0 %v1065_v35  ;;  %v1068_v37 = vsel %vm1052_vm2, %v1384_v36, 0.0 }
 0x397   : > { %1069 = vadd.xlane.f32.xlu0 %v1068_v37 }
 0x420   : > { %v1067_v38 = vpop.xlane.xlu0 %1066 }
 0x421   : > { %1385 = vrcp.f32 %v1067_v38 }
 0x424   : > { %v1070_v39 = vpop.xlane.xlu0 %1069 }
 0x425   : > { %1387 = vrcp.f32 %v1070_v39 }
 0x42b   : > { %v1386_v40 = vpop.eup %1385 }
 0x42c   : > { %v1073_v41 = vmul.f32 %v1386_v40, %v1067_v38 }
 0x42e   : > { %v1075_v42 = vsub.f32 2.0, %v1073_v41 }
 0x42f   : > { %v1388_v43 = vpop.eup %1387 }
 0x430   : > { %v1077_v44 = vmul.f32 %v1386_v40, %v1075_v42  ;;  %v1074_v45 = vmul.f32 %v1388_v43, %v1070_v39 }
 0x432   : > { %v1079_v46 = vmul.f32 %v1077_v44, %v1067_v38  ;;  %v1076_v47 = vsub.f32 2.0, %v1074_v45 }
 0x434   : > { %v1081_v48 = vsub.f32 2.0, %v1079_v46  ;;  %v1078_v49 = vmul.f32 %v1388_v43, %v1076_v47 }
 0x436   : > { %v1083_v50 = vmul.f32 %v1081_v48, %v1077_v44  ;;  %v1080_v51 = vmul.f32 %v1078_v49, %v1070_v39 }
 0x438   : > { %v1085_v52 = vmul.f32 %v1382_v34, %v1083_v50  ;;  %v1082_v53 = vsub.f32 2.0, %v1080_v51 }
 0x43a   : > { %1087 = vst.msk [vmem:[%s351_s9] sm:$0xff] %vm1052_vm2, %v1085_v52  ;;  %v1084_v54 = vmul.f32 %v1082_v53, %v1078_v49 }
 0x43c   : > { %v1086_v55 = vmul.f32 %v1384_v36, %v1084_v54 }
 0x43e   : > { %1088 = vst.msk [vmem:[%s351_s9 + $0x8] sm:$0xff] %vm1052_vm2, %v1086_v55 }
 0x43f PF: > { %p19_p1 = scmp.ge.s32.totalorder %s1763_s18, 4   ;;  %s1921_s24 = smov %s1565_s25 }
 0x440   : > { %s1922_s25 = smov %s1569_s26  ;;  %s1923_s26 = smov %s1775_s28 }
 0x441   : > { %s1924_s27 = smov %s1763_s18  ;;  %21 = sbr.rel (!%p19_p1) target bundleno = 5 (0x5), region = 104 }
 0x448   :  { %1110 = vsyncpa [#allocation3], 1 }
 0x449   :  { %1112 = vsyncpa [#allocation3 + $0x1], 1 }
 0x44a   :  { %1113 = vsyncpa [#allocation5], 1 }
 0x44b   :  { %1114 = vsyncpa [#allocation8], 1 }

</bundles_post_ra>
